<compile_context>
chip_gen: v5e
topology: v5e:2x2
jax: 0.10.0
libtpu: 0.0.40
codegen_flags: <defaults>
</compile_context>

<pallas_src>
import jax
import jax.numpy as jnp
from jax import lax
from jax.experimental import pallas as pl
from jax.experimental.pallas import tpu as pltpu

_LANES = 128  # vreg lane width; keeps the output store lane-dense / unmasked


def _mix_u32(x):
    """Murmur3-finalizer-style 32-bit mix. Pure VALU bit ops, no EUP/XLU."""
    x = x ^ (x >> 16)
    x = x * jnp.uint32(0x7FEB352D)
    x = x ^ (x >> 15)
    x = x * jnp.uint32(0x846CA68B)
    x = x ^ (x >> 16)
    return x


def _uniform_kernel(seed_ref, out_ref):
    # seed_ref : SMEM (1,) int32   -- per-call seed
    # out_ref  : VMEM (rows, 128) float32 -- uniforms in [0, 1)
    rows, lanes = out_ref.shape
    seed = seed_ref[0].astype(jnp.uint32)

    row = lax.broadcasted_iota(jnp.int32, (rows, lanes), 0)
    col = lax.broadcasted_iota(jnp.int32, (rows, lanes), 1)
    ctr = (row * lanes + col).astype(jnp.uint32)

    # Counter-based PRNG: mix (counter, seed) twice for decorrelation.
    bits = _mix_u32(ctr ^ (seed * jnp.uint32(0x9E3779B9)))
    bits = _mix_u32(bits + seed)

    # Exponent-OR trick: top 23 random bits as mantissa of a float in [1, 2),
    # then subtract 1.0 -> uniform in [0, 1). Avoids the int->float convert.
    mant = (bits >> 9) | jnp.uint32(0x3F800000)
    out_ref[...] = lax.bitcast_convert_type(mant, jnp.float32) - jnp.float32(1.0)


def dummy_value_uniform(n, seed):
    """Generate n uniform [0,1) float32 values in a single pallas_call."""
    rows = pl.cdiv(max(int(n), 1), _LANES)
    rows = ((rows + 7) // 8) * 8  # whole (8,128) vreg tiles -> unmasked stores
    seed_arr = jnp.asarray([int(seed) & 0x7FFFFFFF], dtype=jnp.int32)
    out = pl.pallas_call(
        _uniform_kernel,
        out_shape=jax.ShapeDtypeStruct((rows, _LANES), jnp.float32),
        in_specs=[pl.BlockSpec(memory_space=pltpu.MemorySpace.SMEM)],   # seed scalar
        out_specs=pl.BlockSpec(memory_space=pltpu.MemorySpace.VMEM),
    )(seed_arr)
    return out.reshape(-1)[:n]


# Host-side call counter emulating torch's advancing global RNG state, so
# repeated forward() calls yield different values (MCTS exploration).
# TODO(synk): under jit, pass an explicit per-call seed instead (the Python
# counter only advances in eager mode).
_CALL_COUNTER = [0]


def dummy_value_network(x, seed=None):
    """Pallas equivalent of DummyValueNetwork.forward(x) -> shape (1,) float32.

    x is accepted for interface fidelity but is ignored (exactly like the
    PyTorch module) and is never handed to the kernel, so no DMA is issued
    for it.
    """
    del x  # unused by the module's forward
    if seed is None:
        seed = _CALL_COUNTER[0]
        _CALL_COUNTER[0] += 1
    return dummy_value_uniform(1, seed)


if __name__ == "__main__":
    key = jax.random.PRNGKey(0)
    # Small NCHW input consistent with a value-network style module (ignored).
    x = jax.random.normal(key, (2, 4, 16, 16), dtype=jnp.float32)

    # Single-value forward, matching torch.rand(1).
    val = jax.block_until_ready(dummy_value_network(x))
    assert val.shape == (1,), f"expected shape (1,), got {val.shape}"
    assert val.dtype == jnp.float32, f"expected float32, got {val.dtype}"
    assert bool(val[0] >= 0.0) and bool(val[0] < 1.0), f"value out of [0,1): {val}"

    # Second call advances the seed -> (almost surely) a different value.
    val2 = jax.block_until_ready(dummy_value_network(x))

    # Batched generation: many MCTS leaves per launch.
    batch = jax.block_until_ready(dummy_value_uniform(512, seed=123))
    assert batch.shape == (512,)
    assert bool(jnp.all(batch >= 0.0)) and bool(jnp.all(batch < 1.0))

    print("KERNEL_OK")
</pallas_src>

<mosaic_0001>
module attributes {stable_mosaic.version = 11 : i64} {
  func.func @_uniform_kernel(%arg0: memref<1xi32, #tpu.memory_space<smem>>, %arg1: memref<8x128xf32, #tpu.memory_space<vmem>>) attributes {dimension_semantics = [], scalar_prefetch = 0 : i64, scratch_operands = 0 : i64, tpu.core_type = #tpu.core_type<tc>} {
    %c0 = arith.constant 0 : index
    %0 = memref.load %arg0[%c0] : memref<1xi32, #tpu.memory_space<smem>>
    %1 = tpu.iota {dimensions = array<i32: 0>} : vector<8x128xi32>
    %2 = tpu.iota {dimensions = array<i32: 1>} : vector<8x128xi32>
    %c128_i32 = arith.constant 128 : i32
    %3 = vector.broadcast %c128_i32 : i32 to vector<8x128xi32>
    %4 = arith.muli %1, %3 : vector<8x128xi32>
    %5 = arith.addi %4, %2 : vector<8x128xi32>
    %c-1640531527_i32 = arith.constant -1640531527 : i32
    %6 = arith.muli %0, %c-1640531527_i32 : i32
    %7 = vector.broadcast %6 : i32 to vector<8x128xi32>
    %8 = arith.xori %5, %7 : vector<8x128xi32>
    %c16_i32 = arith.constant 16 : i32
    %9 = vector.broadcast %c16_i32 : i32 to vector<8x128xi32>
    %10 = arith.shrui %8, %9 : vector<8x128xi32>
    %11 = arith.xori %8, %10 : vector<8x128xi32>
    %c2146121005_i32 = arith.constant 2146121005 : i32
    %12 = vector.broadcast %c2146121005_i32 : i32 to vector<8x128xi32>
    %13 = arith.muli %11, %12 : vector<8x128xi32>
    %c15_i32 = arith.constant 15 : i32
    %14 = vector.broadcast %c15_i32 : i32 to vector<8x128xi32>
    %15 = arith.shrui %13, %14 : vector<8x128xi32>
    %16 = arith.xori %13, %15 : vector<8x128xi32>
    %c-2073254261_i32 = arith.constant -2073254261 : i32
    %17 = vector.broadcast %c-2073254261_i32 : i32 to vector<8x128xi32>
    %18 = arith.muli %16, %17 : vector<8x128xi32>
    %c16_i32_0 = arith.constant 16 : i32
    %19 = vector.broadcast %c16_i32_0 : i32 to vector<8x128xi32>
    %20 = arith.shrui %18, %19 : vector<8x128xi32>
    %21 = arith.xori %18, %20 : vector<8x128xi32>
    %22 = vector.broadcast %0 : i32 to vector<8x128xi32>
    %23 = arith.addi %21, %22 : vector<8x128xi32>
    %c16_i32_1 = arith.constant 16 : i32
    %24 = vector.broadcast %c16_i32_1 : i32 to vector<8x128xi32>
    %25 = arith.shrui %23, %24 : vector<8x128xi32>
    %26 = arith.xori %23, %25 : vector<8x128xi32>
    %c2146121005_i32_2 = arith.constant 2146121005 : i32
    %27 = vector.broadcast %c2146121005_i32_2 : i32 to vector<8x128xi32>
    %28 = arith.muli %26, %27 : vector<8x128xi32>
    %c15_i32_3 = arith.constant 15 : i32
    %29 = vector.broadcast %c15_i32_3 : i32 to vector<8x128xi32>
    %30 = arith.shrui %28, %29 : vector<8x128xi32>
    %31 = arith.xori %28, %30 : vector<8x128xi32>
    %c-2073254261_i32_4 = arith.constant -2073254261 : i32
    %32 = vector.broadcast %c-2073254261_i32_4 : i32 to vector<8x128xi32>
    %33 = arith.muli %31, %32 : vector<8x128xi32>
    %c16_i32_5 = arith.constant 16 : i32
    %34 = vector.broadcast %c16_i32_5 : i32 to vector<8x128xi32>
    %35 = arith.shrui %33, %34 : vector<8x128xi32>
    %36 = arith.xori %33, %35 : vector<8x128xi32>
    %c9_i32 = arith.constant 9 : i32
    %37 = vector.broadcast %c9_i32 : i32 to vector<8x128xi32>
    %38 = arith.shrui %36, %37 : vector<8x128xi32>
    %c1065353216_i32 = arith.constant 1065353216 : i32
    %39 = vector.broadcast %c1065353216_i32 : i32 to vector<8x128xi32>
    %40 = arith.ori %38, %39 : vector<8x128xi32>
    %41 = tpu.bitcast %40 : vector<8x128xi32> -> vector<8x128xf32>
    %cst = arith.constant 1.000000e+00 : f32
    %42 = vector.broadcast %cst : f32 to vector<8x128xf32>
    %43 = arith.subf %41, %42 : vector<8x128xf32>
    %c0_6 = arith.constant 0 : index
    %c0_7 = arith.constant 0 : index
    %44 = vector.load %arg1[%c0_6, %c0_7] : memref<8x128xf32, #tpu.memory_space<vmem>>, vector<8x128xf32>
    tpu.vector_store %arg1[%c0_6, %c0_7], %43 {strides = array<i32>} : memref<8x128xf32, #tpu.memory_space<vmem>>, vector<8x128xf32>,
    return
  }
}

</mosaic_0001>

<bundles_post_ra>
// kernel: tpu_custom_call.1
= control target key start
LH: loop header
LB: loop body
LE: loop exit
PB: predicated region body
PF: predicated region fallthrough
CT: control target
= control target key end

     0   :  { %v11_v0 = vlaneseq  ;;  %s107_s0 = inlined_call_operand.<no memory space> [shape: s32[1], index: 0, kind: input, shape index: {}]   ;;  %s108_s1 = inlined_call_operand.hbm [shape: f32[8,128], index: 1, kind: output, shape index: {}]  }
   0x1   :  { %7 = vsyncpa [#allocation4], 0  ;;  %s17_s8 = smul.u32 2654435769, %s107_s0  ;;  %v28_v14 = vstv %s107_s0  ;;  %s87_s11 = smov [#allocation3]  }
   0x2   :  { %v12_v1 = vshrl.u32 %v11_v0, 7  ;;  %v14_v2 = vand.u32 127, %v11_v0  ;;  %s48_s12 = sshll.u32 %s87_s11, 4  ;;  %s50_s15 = sshll.u32 %s108_s1, 4  ;;  %s49_s12 = int_to_ptr.vmem [resolvable:$true] %s48_s12  ;;  %s51_s15 = int_to_ptr.hbm [resolvable:$true] %s50_s15 }
   0x3   :  { %v18_v4 = vstv %s17_s8 }
   0x4   :  { %v15_v3 = vmul.u32 128, %v12_v1 }
   0x6   :  { %v16_v5 = vadd.s32 %v15_v3, %v14_v2 }
   0x8   :  { %v19_v6 = vxor.u32 %v18_v4, %v16_v5 }
   0xa   :  { %v20_v7 = vshrl.u32 %v19_v6, 16 }
   0xc   :  { %v21_v8 = vxor.u32 %v20_v7, %v19_v6 }
   0xe   :  { %v22_v9 = vmul.u32 2146121005, %v21_v8 }
  0x10   :  { %v23_v10 = vshrl.u32 %v22_v9, 15 }
  0x12   :  { %v24_v11 = vxor.u32 %v23_v10, %v22_v9 }
  0x14   :  { %v25_v12 = vmul.u32 2221713035, %v24_v11 }
  0x16   :  { %v26_v13 = vshrl.u32 %v25_v12, 16 }
  0x18   :  { %v27_v15 = vxor.u32 %v26_v13, %v25_v12 }
  0x1a   :  { %v29_v16 = vadd.s32 %v28_v14, %v27_v15 }
  0x1c   :  { %v30_v17 = vshrl.u32 %v29_v16, 16 }
  0x1e   :  { %v31_v18 = vxor.u32 %v30_v17, %v29_v16 }
  0x20   :  { %v32_v19 = vmul.u32 2146121005, %v31_v18 }
  0x22   :  { %v33_v20 = vshrl.u32 %v32_v19, 15 }
  0x24   :  { %v34_v21 = vxor.u32 %v33_v20, %v32_v19 }
  0x26   :  { %v35_v22 = vmul.u32 2221713035, %v34_v21 }
  0x28   :  { %v36_v23 = vshrl.u32 %v35_v22, 16 }
  0x2a   :  { %v37_v24 = vxor.u32 %v36_v23, %v35_v22 }
  0x2c   :  { %v38_v25 = vshrl.u32 %v37_v24, 9 }
  0x2e   :  { %v39_v26 = vor.u32 1065353216, %v38_v25 }
  0x30   :  { %v59_v27 = vadd.f32 -1.0, %v39_v26 }
  0x32   :  { %42 = vst [vmem:[#allocation3] sm:$0xff] %v59_v27 }
  0x33   :  { %53 = dma.vmem_to_hbm [thread:$0]  %s49_s12, 128, %s51_s15, [#allocation4]  }
  0x34   :  { %85 = dma.done.wait [#allocation4], 128  }
  0x35   :  { %86 = vsyncadd [#allocation4], 4294967168 }
  0x36   :  { %58 = vsyncpa [#allocation4], 1 }

</bundles_post_ra>
